<compile_context>
chip_gen: v7x
topology: tpu7x:2x2x1
jax: 0.10.0
libtpu: 0.0.40
codegen_flags: <defaults>
</compile_context>

<pallas_src>
import functools

import numpy as np

import jax
import jax.numpy as jnp
from jax import lax
from jax.experimental import pallas as pl
from jax.experimental.pallas import tpu as pltpu


def _stats_angle_kernel(ti_ref, tj_ref, fi_ref, fj_ref, li_ref, lj_ref,
                        out_ref, *, scale):
    """One (tm x tm) upper-triangular tile of the B x B Gram-difference sum.

    ti_ref / tj_ref : SMEM int32[nsteps] scalar-prefetched tile indices.
    fi_ref / fj_ref : (tm, D) or (tm, T, D) feature tiles (rows ti / rows tj).
    li_ref / lj_ref : int labels  -> (tm, 1) and (1, tm) int32 tiles,
                      soft labels -> (tm, C) float tiles (matmul fallback).
    out_ref         : (1, 1) f32 accumulator, resident across the whole grid.
    """
    k = pl.program_id(0)

    @pl.when(k == 0)
    def _():
        out_ref[...] = jnp.zeros_like(out_ref)

    ti = ti_ref[k]
    tj = tj_ref[k]

    def _mean_normalize(ref):
        x = ref[...].astype(jnp.float32)
        if x.ndim == 3:                      # fused sequence mean over T
            x = jnp.mean(x, axis=1)
        sumsq = jnp.sum(x * x, axis=1, keepdims=True)
        # F.normalize(p=2, eps=1e-12): x / max(||x||, 1e-12)
        #                            == x * rsqrt(max(sumsq, 1e-24))
        return x * lax.rsqrt(jnp.maximum(sumsq, jnp.float32(1e-24)))

    fi = _mean_normalize(fi_ref)             # (tm, D)
    fj = _mean_normalize(fj_ref)             # (tm, D)

    # Feature Gram tile on the MXU; contract the feature axis of both operands
    # (no explicit transpose).  f32 inputs keep the tight accuracy target.
    dn = (((1,), (1,)), ((), ()))
    gram_f = lax.dot_general(fi, fj, dn, preferred_element_type=jnp.float32)
    tm = gram_f.shape[0]

    if jnp.issubdtype(li_ref.dtype, jnp.integer):
        # Gram of row-normalized one-hot rows == label-equality mask (VPU only).
        gram_l = (li_ref[...] == lj_ref[...]).astype(jnp.float32)  # (tm,1)==(1,tm)
    else:
        # 2-D / soft labels: normalize rows and use the MXU (reference path).
        gi = _mean_normalize(li_ref)
        gj = _mean_normalize(lj_ref)
        gram_l = lax.dot_general(gi, gj, dn, preferred_element_type=jnp.float32)

    # (embeds_dist - labels_dist)^2 == (gram_l - gram_f)^2 (the "1 -" cancels).
    dif = (gram_l - gram_f) ** 2

    # Zero the *global* B x B diagonal (dif.fill_diagonal_(0)); only diagonal
    # tiles (ti == tj) can contain global-diagonal entries, but the masked
    # where is cheap VPU work so it is applied unconditionally.
    row_g = ti * tm + lax.broadcasted_iota(jnp.int32, (tm, tm), 0)
    col_g = tj * tm + lax.broadcasted_iota(jnp.int32, (tm, tm), 1)
    dif = jnp.where(row_g == col_g, 0.0, dif)

    # Symmetry: strict upper-triangle tiles stand in for their transpose too.
    w = jnp.where(ti == tj, jnp.float32(1.0), jnp.float32(2.0))
    out_ref[...] += w * jnp.sum(dif, keepdims=True)

    @pl.when(k == pl.num_programs(0) - 1)
    def _():
        # Fused final scale: mean over the true B*B entries times mean_lambda.
        out_ref[...] = out_ref[...] * scale


def _pick_tile(batch, row_elems, elem_bytes, max_tile, vmem_budget=64 << 20):
    """Pick the Gram-tile size and the (possibly padded) batch.

    Small batches use a single full block (no padding; full-dim blocks are
    exempt from the (8,128) rule).  Large batches use a multiple-of-128 tile,
    shrunk if two double-buffered feature tiles would blow the VMEM budget.
    """
    if batch <= max_tile:
        return batch, batch
    tm = max(128, (int(max_tile) // 128) * 128)
    per_row = row_elems * elem_bytes
    while tm > 128 and 4 * tm * per_row > vmem_budget:   # 2 tiles x 2 buffers
        tm -= 128
    padded = pl.cdiv(batch, tm) * tm
    return tm, padded


def stats_angle_loss(features, labels, *, mean_lambda, std_lambda, n_classes,
                     max_tile=512):
    """Pallas equivalent of StatsAngleLoss.forward (returns mean_lambda * loss_mean)."""
    del std_lambda, n_classes  # loss_std is dead code; one-hot never materialized.
    B = features.shape[0]
    row_elems = int(np.prod(features.shape[1:]))
    tm, Bp = _pick_tile(B, row_elems, features.dtype.itemsize, max_tile)
    pad = Bp - B
    nT = Bp // tm

    if pad:
        widths = [(0, pad)] + [(0, 0)] * (features.ndim - 1)
        features = jnp.pad(features, widths)   # zero rows -> zero contribution

    # Static upper-triangular tile schedule (row-major so the fi row-tile is
    # revisited consecutively and its DMA can be skipped by the pipeline).
    ti_list, tj_list = [], []
    for a in range(nT):
        for b in range(a, nT):
            ti_list.append(a)
            tj_list.append(b)
    ti_arr = jnp.asarray(np.asarray(ti_list, dtype=np.int32))
    tj_arr = jnp.asarray(np.asarray(tj_list, dtype=np.int32))
    nsteps = len(ti_list)

    if features.ndim == 3:
        _, T, D = features.shape
        f_spec_i = pl.BlockSpec((tm, T, D), lambda k, ti, tj: (ti[k], 0, 0))
        f_spec_j = pl.BlockSpec((tm, T, D), lambda k, ti, tj: (tj[k], 0, 0))
    else:
        D = features.shape[1]
        f_spec_i = pl.BlockSpec((tm, D), lambda k, ti, tj: (ti[k], 0))
        f_spec_j = pl.BlockSpec((tm, D), lambda k, ti, tj: (tj[k], 0))

    if labels.ndim == 1:
        lab = labels.astype(jnp.int32)
        if pad:
            # Distinct negative pad ids never equal a real (>= 0) label or each
            # other, so padded rows add exactly zero to the loss.
            lab = jnp.concatenate(
                [lab, -(jnp.arange(pad, dtype=jnp.int32) + 1)])
        l_args = (lab.reshape(Bp, 1), lab.reshape(1, Bp))
        l_specs = [pl.BlockSpec((tm, 1), lambda k, ti, tj: (ti[k], 0)),
                   pl.BlockSpec((1, tm), lambda k, ti, tj: (0, tj[k]))]
    else:
        lab = labels.astype(jnp.float32)
        if pad:
            lab = jnp.pad(lab, ((0, pad), (0, 0)))   # zero rows normalize to 0
        C = lab.shape[1]
        l_args = (lab, lab)
        l_specs = [pl.BlockSpec((tm, C), lambda k, ti, tj: (ti[k], 0)),
                   pl.BlockSpec((tm, C), lambda k, ti, tj: (tj[k], 0))]

    kernel = functools.partial(
        _stats_angle_kernel, scale=float(mean_lambda) / float(B * B))

    total = pl.pallas_call(
        kernel,
        out_shape=jax.ShapeDtypeStruct((1, 1), jnp.float32),
        grid_spec=pltpu.PrefetchScalarGridSpec(
            num_scalar_prefetch=2,
            grid=(nsteps,),
            in_specs=[f_spec_i, f_spec_j, *l_specs],
            out_specs=pl.BlockSpec((1, 1), lambda k, ti, tj: (0, 0))),
        compiler_params=pltpu.CompilerParams(
            # All steps accumulate into the same resident (1, 1) output block,
            # so the single grid axis is a reduction ("arbitrary").
            dimension_semantics=("arbitrary",)),
    )(ti_arr, tj_arr, features, features, *l_args)

    return total[0, 0]


def _reference(features, labels, *, mean_lambda, n_classes):
    """Plain-JAX reference for sanity checking (mirrors the PyTorch module)."""
    if features.ndim == 3:
        features = features.mean(axis=1)
    f = features.astype(jnp.float32)
    f = f / jnp.maximum(jnp.linalg.norm(f, axis=1, keepdims=True), 1e-12)
    if labels.ndim == 1:
        lab = jax.nn.one_hot(labels, n_classes, dtype=jnp.float32)
    else:
        lab = labels.astype(jnp.float32)
    lab = lab / jnp.maximum(jnp.linalg.norm(lab, axis=1, keepdims=True), 1e-12)
    labels_dist = 1.0 - lab @ lab.T
    embeds_dist = 1.0 - f @ f.T
    dif = (embeds_dist - labels_dist) ** 2
    dif = dif * (1.0 - jnp.eye(dif.shape[0], dtype=dif.dtype))
    return mean_lambda * dif.mean()


if __name__ == "__main__":
    key = jax.random.PRNGKey(0)
    k1, k2, k3, k4 = jax.random.split(key, 4)

    n_classes = 10
    mean_lambda, std_lambda = 1.0, 0.5

    # (1) Small: (B, T, D) features + integer labels (equality-mask label path,
    #     fused sequence mean), single-block grid.
    B, T, D = 8, 4, 32
    feats = jax.random.normal(k1, (B, T, D), dtype=jnp.float32)
    labs = jax.random.randint(k2, (B,), 0, n_classes)
    out = stats_angle_loss(feats, labs, mean_lambda=mean_lambda,
                           std_lambda=std_lambda, n_classes=n_classes)
    jax.block_until_ready(out)
    ref = _reference(feats, labs, mean_lambda=mean_lambda, n_classes=n_classes)
    assert jnp.allclose(out, ref, atol=1e-5, rtol=1e-5), (out, ref)

    # (2) 2-D features + pre-one-hot (float) labels: matmul fallback path.
    feats2 = feats.mean(axis=1)
    labs2 = jax.nn.one_hot(labs, n_classes, dtype=jnp.float32)
    out2 = stats_angle_loss(feats2, labs2, mean_lambda=mean_lambda,
                            std_lambda=std_lambda, n_classes=n_classes)
    jax.block_until_ready(out2)
    assert jnp.allclose(out2, ref, atol=1e-5, rtol=1e-5), (out2, ref)

    # (3) Larger, non-multiple-of-128 batch: exercises padding + the triangular
    #     tile schedule (nT=2 -> 3 steps) + the off-diagonal weight of 2.
    Bb = 200
    feats3 = jax.random.normal(k3, (Bb, T, D), dtype=jnp.float32)
    labs3 = jax.random.randint(k4, (Bb,), 0, n_classes)
    out3 = stats_angle_loss(feats3, labs3, mean_lambda=mean_lambda,
                            std_lambda=std_lambda, n_classes=n_classes,
                            max_tile=128)
    jax.block_until_ready(out3)
    ref3 = _reference(feats3, labs3, mean_lambda=mean_lambda, n_classes=n_classes)
    assert jnp.allclose(out3, ref3, atol=1e-5, rtol=1e-4), (out3, ref3)

    print("KERNEL_OK")
</pallas_src>

<mosaic_0001>
module attributes {stable_mosaic.version = 11 : i64} {
  func.func @_stats_angle_kernel(%arg0: i32, %arg1: memref<1xi32, #tpu.memory_space<smem>>, %arg2: memref<1xi32, #tpu.memory_space<smem>>, %arg3: memref<8x4x32xf32, #tpu.memory_space<vmem>>, %arg4: memref<8x4x32xf32, #tpu.memory_space<vmem>>, %arg5: memref<8x1xi32, #tpu.memory_space<vmem>>, %arg6: memref<1x8xi32, #tpu.memory_space<vmem>>, %arg7: memref<1x1xf32, #tpu.memory_space<vmem>>) attributes {dimension_semantics = [#tpu.dimension_semantics<arbitrary>], iteration_bounds = array<i64: 1>, scalar_prefetch = 2 : i64, scratch_operands = 0 : i64, tpu.core_type = #tpu.core_type<tc>, window_params = [{transform_indices = @transform_0, window_bounds = array<i64: 8, 4, 32>}, {transform_indices = @transform_1, window_bounds = array<i64: 8, 4, 32>}, {transform_indices = @transform_2, window_bounds = array<i64: 8, 1>}, {transform_indices = @transform_3, window_bounds = array<i64: 1, 8>}, {pipeline_mode = #tpu.pipeline_mode<synchronous>, transform_indices = @transform_4, window_bounds = array<i64: 1, 1>}]} {
    %c0_i32 = arith.constant 0 : i32
    %0 = arith.cmpi eq, %arg0, %c0_i32 : i32
    %1 = arith.extui %0 : i1 to i32
    %c0_i32_0 = arith.constant 0 : i32
    %2 = arith.cmpi ne, %1, %c0_i32_0 : i32
    scf.if %2 {
      %cst_29 = arith.constant 0.000000e+00 : f32
      %67 = vector.broadcast %cst_29 : f32 to vector<1x1xf32>
      %c0_30 = arith.constant 0 : index
      %c0_31 = arith.constant 0 : index
      %68 = vector.load %arg7[%c0_30, %c0_31] : memref<1x1xf32, #tpu.memory_space<vmem>>, vector<1x1xf32>
      tpu.vector_store %arg7[%c0_30, %c0_31], %67 {strides = array<i32>} : memref<1x1xf32, #tpu.memory_space<vmem>>, vector<1x1xf32>,
    } else {
    }
    %3 = arith.index_cast %arg0 : i32 to index
    %4 = memref.load %arg1[%3] : memref<1xi32, #tpu.memory_space<smem>>
    %5 = arith.index_cast %arg0 : i32 to index
    %6 = memref.load %arg2[%5] : memref<1xi32, #tpu.memory_space<smem>>
    %c0 = arith.constant 0 : index
    %c0_1 = arith.constant 0 : index
    %c0_2 = arith.constant 0 : index
    %7 = vector.load %arg3[%c0, %c0_1, %c0_2] : memref<8x4x32xf32, #tpu.memory_space<vmem>>, vector<8x4x32xf32>
    %cst = arith.constant dense<0.000000e+00> : vector<8x32xf32>
    %8 = vector.multi_reduction <add>, %7, %cst [1] : vector<8x4x32xf32> to vector<8x32xf32>
    %cst_3 = arith.constant 4.000000e+00 : f32
    %9 = vector.broadcast %cst_3 : f32 to vector<8x32xf32>
    %10 = arith.divf %8, %9 : vector<8x32xf32>
    %11 = arith.mulf %10, %10 : vector<8x32xf32>
    %cst_4 = arith.constant dense<0.000000e+00> : vector<8xf32>
    %12 = vector.multi_reduction <add>, %11, %cst_4 [1] : vector<8x32xf32> to vector<8xf32>
    %13 = vector.shape_cast %12 : vector<8xf32> to vector<8x1xf32>
    %cst_5 = arith.constant 1.000000e-24 : f32
    %14 = vector.broadcast %cst_5 : f32 to vector<8x1xf32>
    %15 = arith.maximumf %13, %14 : vector<8x1xf32>
    %16 = math.rsqrt %15 : vector<8x1xf32>
    %17 = vector.broadcast %16 : vector<8x1xf32> to vector<8x32xf32>
    %18 = arith.mulf %10, %17 : vector<8x32xf32>
    %c0_6 = arith.constant 0 : index
    %c0_7 = arith.constant 0 : index
    %c0_8 = arith.constant 0 : index
    %19 = vector.load %arg4[%c0_6, %c0_7, %c0_8] : memref<8x4x32xf32, #tpu.memory_space<vmem>>, vector<8x4x32xf32>
    %cst_9 = arith.constant dense<0.000000e+00> : vector<8x32xf32>
    %20 = vector.multi_reduction <add>, %19, %cst_9 [1] : vector<8x4x32xf32> to vector<8x32xf32>
    %cst_10 = arith.constant 4.000000e+00 : f32
    %21 = vector.broadcast %cst_10 : f32 to vector<8x32xf32>
    %22 = arith.divf %20, %21 : vector<8x32xf32>
    %23 = arith.mulf %22, %22 : vector<8x32xf32>
    %cst_11 = arith.constant dense<0.000000e+00> : vector<8xf32>
    %24 = vector.multi_reduction <add>, %23, %cst_11 [1] : vector<8x32xf32> to vector<8xf32>
    %25 = vector.shape_cast %24 : vector<8xf32> to vector<8x1xf32>
    %cst_12 = arith.constant 1.000000e-24 : f32
    %26 = vector.broadcast %cst_12 : f32 to vector<8x1xf32>
    %27 = arith.maximumf %25, %26 : vector<8x1xf32>
    %28 = math.rsqrt %27 : vector<8x1xf32>
    %29 = vector.broadcast %28 : vector<8x1xf32> to vector<8x32xf32>
    %30 = arith.mulf %22, %29 : vector<8x32xf32>
    %cst_13 = arith.constant dense<0.000000e+00> : vector<8x8xf32>
    %31 = tpu.matmul %18, %30, %cst_13 {dimension_numbers = #tpu.dot_dimension_numbers<[1], [1], [0], [0], [0, 0, 1, 0], [], []>} : vector<8x32xf32>, vector<8x32xf32>, vector<8x8xf32> -> vector<8x8xf32>
    %c0_14 = arith.constant 0 : index
    %c0_15 = arith.constant 0 : index
    %32 = vector.load %arg5[%c0_14, %c0_15] : memref<8x1xi32, #tpu.memory_space<vmem>>, vector<8x1xi32>
    %c0_16 = arith.constant 0 : index
    %c0_17 = arith.constant 0 : index
    %33 = vector.load %arg6[%c0_16, %c0_17] : memref<1x8xi32, #tpu.memory_space<vmem>>, vector<1x8xi32>
    %34 = vector.broadcast %32 : vector<8x1xi32> to vector<8x8xi32>
    %35 = vector.broadcast %33 : vector<1x8xi32> to vector<8x8xi32>
    %36 = arith.cmpi eq, %34, %35 : vector<8x8xi32>
    %37 = arith.extui %36 : vector<8x8xi1> to vector<8x8xi32>
    %38 = arith.sitofp %37 : vector<8x8xi32> to vector<8x8xf32>
    %39 = arith.subf %38, %31 : vector<8x8xf32>
    %40 = arith.mulf %39, %39 : vector<8x8xf32>
    %c8_i32 = arith.constant 8 : i32
    %41 = arith.muli %4, %c8_i32 : i32
    %42 = tpu.iota {dimensions = array<i32: 0>} : vector<8x8xi32>
    %43 = vector.broadcast %41 : i32 to vector<8x8xi32>
    %44 = arith.addi %43, %42 : vector<8x8xi32>
    %c8_i32_18 = arith.constant 8 : i32
    %45 = arith.muli %6, %c8_i32_18 : i32
    %46 = tpu.iota {dimensions = array<i32: 1>} : vector<8x8xi32>
    %47 = vector.broadcast %45 : i32 to vector<8x8xi32>
    %48 = arith.addi %47, %46 : vector<8x8xi32>
    %49 = arith.cmpi eq, %44, %48 : vector<8x8xi32>
    %cst_19 = arith.constant 0.000000e+00 : f32
    %50 = vector.broadcast %cst_19 : f32 to vector<8x8xf32>
    %51 = arith.select %49, %50, %40 : vector<8x8xi1>, vector<8x8xf32>
    %52 = arith.cmpi eq, %4, %6 : i32
    %cst_20 = arith.constant 1.000000e+00 : f32
    %cst_21 = arith.constant 2.000000e+00 : f32
    %53 = arith.select %52, %cst_20, %cst_21 : f32
    %c0_22 = arith.constant 0 : index
    %c0_23 = arith.constant 0 : index
    %54 = vector.load %arg7[%c0_22, %c0_23] : memref<1x1xf32, #tpu.memory_space<vmem>>, vector<1x1xf32>
    %55 = vector.shape_cast %51 : vector<8x8xf32> to vector<1x8x8xf32>
    %cst_24 = arith.constant dense<0.000000e+00> : vector<1xf32>
    %56 = vector.multi_reduction <add>, %55, %cst_24 [1, 2] : vector<1x8x8xf32> to vector<1xf32>
    %57 = vector.shape_cast %56 : vector<1xf32> to vector<1x1x1xf32>
    %58 = vector.extract %57[0, 0, 0] : f32 from vector<1x1x1xf32>
    %59 = vector.broadcast %58 : f32 to vector<1x1xf32>
    %60 = vector.broadcast %53 : f32 to vector<1x1xf32>
    %61 = arith.mulf %60, %59 : vector<1x1xf32>
    %62 = arith.addf %54, %61 : vector<1x1xf32>
    %c0_25 = arith.constant 0 : index
    %c0_26 = arith.constant 0 : index
    %63 = vector.load %arg7[%c0_25, %c0_26] : memref<1x1xf32, #tpu.memory_space<vmem>>, vector<1x1xf32>
    tpu.vector_store %arg7[%c0_25, %c0_26], %62 {strides = array<i32>} : memref<1x1xf32, #tpu.memory_space<vmem>>, vector<1x1xf32>,
    %c0_i32_27 = arith.constant 0 : i32
    %64 = arith.cmpi eq, %arg0, %c0_i32_27 : i32
    %65 = arith.extui %64 : i1 to i32
    %c0_i32_28 = arith.constant 0 : i32
    %66 = arith.cmpi ne, %65, %c0_i32_28 : i32
    scf.if %66 {
      %c0_29 = arith.constant 0 : index
      %c0_30 = arith.constant 0 : index
      %67 = vector.load %arg7[%c0_29, %c0_30] : memref<1x1xf32, #tpu.memory_space<vmem>>, vector<1x1xf32>
      %cst_31 = arith.constant 1.562500e-02 : f32
      %68 = vector.broadcast %cst_31 : f32 to vector<1x1xf32>
      %69 = arith.mulf %67, %68 : vector<1x1xf32>
      %c0_32 = arith.constant 0 : index
      %c0_33 = arith.constant 0 : index
      %70 = vector.load %arg7[%c0_32, %c0_33] : memref<1x1xf32, #tpu.memory_space<vmem>>, vector<1x1xf32>
      tpu.vector_store %arg7[%c0_32, %c0_33], %69 {strides = array<i32>} : memref<1x1xf32, #tpu.memory_space<vmem>>, vector<1x1xf32>,
    } else {
    }
    return
  }
  func.func @transform_0(%arg0: i32, %arg1: memref<1xi32, #tpu.memory_space<smem>>, %arg2: memref<1xi32, #tpu.memory_space<smem>>) -> (i32, i32, i32) {
    %0 = arith.index_cast %arg0 : i32 to index
    %1 = memref.load %arg1[%0] : memref<1xi32, #tpu.memory_space<smem>>
    %c0_i32 = arith.constant 0 : i32
    %c0_i32_0 = arith.constant 0 : i32
    %c0_i32_1 = arith.constant 0 : i32
    return %1, %c0_i32, %c0_i32_0 : i32, i32, i32
  }
  func.func @transform_1(%arg0: i32, %arg1: memref<1xi32, #tpu.memory_space<smem>>, %arg2: memref<1xi32, #tpu.memory_space<smem>>) -> (i32, i32, i32) {
    %0 = arith.index_cast %arg0 : i32 to index
    %1 = memref.load %arg2[%0] : memref<1xi32, #tpu.memory_space<smem>>
    %c0_i32 = arith.constant 0 : i32
    %c0_i32_0 = arith.constant 0 : i32
    %c0_i32_1 = arith.constant 0 : i32
    return %1, %c0_i32, %c0_i32_0 : i32, i32, i32
  }
  func.func @transform_2(%arg0: i32, %arg1: memref<1xi32, #tpu.memory_space<smem>>, %arg2: memref<1xi32, #tpu.memory_space<smem>>) -> (i32, i32) {
    %0 = arith.index_cast %arg0 : i32 to index
    %1 = memref.load %arg1[%0] : memref<1xi32, #tpu.memory_space<smem>>
    %c0_i32 = arith.constant 0 : i32
    %c0_i32_0 = arith.constant 0 : i32
    return %1, %c0_i32 : i32, i32
  }
  func.func @transform_3(%arg0: i32, %arg1: memref<1xi32, #tpu.memory_space<smem>>, %arg2: memref<1xi32, #tpu.memory_space<smem>>) -> (i32, i32) {
    %0 = arith.index_cast %arg0 : i32 to index
    %1 = memref.load %arg2[%0] : memref<1xi32, #tpu.memory_space<smem>>
    %c0_i32 = arith.constant 0 : i32
    %c0_i32_0 = arith.constant 0 : i32
    return %c0_i32, %1 : i32, i32
  }
  func.func @transform_4(%arg0: i32, %arg1: memref<1xi32, #tpu.memory_space<smem>>, %arg2: memref<1xi32, #tpu.memory_space<smem>>) -> (i32, i32) {
    %c0_i32 = arith.constant 0 : i32
    %c0_i32_0 = arith.constant 0 : i32
    %c0_i32_1 = arith.constant 0 : i32
    return %c0_i32, %c0_i32_0 : i32, i32
  }
}

</mosaic_0001>

<bundles_post_ra>
// kernel: tpu_custom_call.1
= control target key start
LH: loop header
LB: loop body
LE: loop exit
PB: predicated region body
PF: predicated region fallthrough
CT: control target
= control target key end

     0   :  { %13 = vsyncpa [#allocation6], 0  ;;  %s916_s0 = inlined_call_operand.<no memory space> [shape: s32[1], index: 0, kind: input, shape index: {}]   ;;  %s917_s1 = inlined_call_operand.<no memory space> [shape: s32[1], index: 1, kind: input, shape index: {}]   ;;  %s918_s2 = inlined_call_operand.hbm [shape: f32[8,4,32], index: 2, kind: input, shape index: {}]   ;;  %s919_s3 = inlined_call_operand.hbm [shape: f32[8,4,32], index: 3, kind: input, shape index: {}]   ;;  %s920_s4 = inlined_call_operand.vmem [shape: s32[8,1], index: 4, kind: input, shape index: {}]   ;;  %s921_s5 = inlined_call_operand.vmem [shape: s32[1,8], index: 5, kind: input, shape index: {}]   ;;  %s922_s6 = inlined_call_operand.hbm [shape: f32[1,1], index: 6, kind: output, shape index: {}]  }
   0x1   :  { %14 = vsyncpa [#allocation9], 0 }
   0x2   :  { %15 = vsyncpa [#allocation7], 0  ;;  %s571_s23 = sshll.u32 %s916_s0, 9  ;;  %s672_s27 = smov [#allocation5]  }
   0x3   :  { %s24_s26 = scalar_lea.hbm %s918_s2, %s571_s23  ;;  %s25_s28 = sshll.u32 %s672_s27, 4  ;;  %s26_s28 = int_to_ptr.vmem [resolvable:$true] %s25_s28 }
   0x4   :  { %s572_s7 = sshll.u32 %s917_s1, 9  ;;  %s596_s8 = scalar_lea.hbm %s24_s26, 512 }
   0x5   :  { %p597_p0 = scmp.ne.s32.totalorder %s24_s26, %s596_s8  ;;  %s598_s11 = scalar_lea.hbm %s918_s2, 512 }
   0x6   :  { %p599_p1 = scmp.lt.u32.totalorder %s24_s26, %s918_s2  ;;  %p600_p2 = scmp.lt.u32.totalorder %s598_s11, %s596_s8 }
   0x7   :  { %p602_p4 = scmp.lt.u32.totalorder %s596_s8, %s24_s26 }
   0x8   :  { %p601_p3 = por %p600_p2, %p599_p1 }
   0xa   :  { %p603_p5 = por %p602_p4, %p601_p3 }
   0xc   :  { %p604_p6 = pnand %p603_p5, %p597_p0 }
   0xe   :  { %607 = shalt.err (!%p604_p6)
}
   0xf   :  { %s608_s14 = scalar_lea.vmem %s26_s28, 512  ;;  %p613_p8 = scmp.lt.s32.totalorder %s26_s28, %s26_s28 }
  0x10   :  { %p609_p7 = scmp.ne.s32.totalorder %s26_s28, %s608_s14  ;;  %p614_p9 = scmp.lt.s32.totalorder %s608_s14, %s608_s14 }
  0x12   :  { %p615_p10 = por %p614_p9, %p613_p8 }
  0x14   :  { %p616_p11 = pnand %p615_p10, %p609_p7 }
  0x16   :  { %619 = shalt.err (!%p616_p11)
}
  0x17   :  { %s673_s15 = smov 64   ;;  %s674_s16 = smov 4  }
  0x18   :  { %31 = dma.hbm_to_vmem [thread:$0]  %s24_s26, 512, %s26_s28, [#allocation6], %s673_s15, %s673_s15, %s674_s16  }
  0x19   :  { %s40_s2 = scalar_lea.hbm %s919_s3, %s572_s7  ;;  %s675_s19 = smov [#allocation8]  }
  0x1a   :  { %s41_s20 = sshll.u32 %s675_s19, 4  ;;  %s620_s21 = scalar_lea.hbm %s40_s2, 512  ;;  %s42_s20 = int_to_ptr.vmem [resolvable:$true] %s41_s20 }
  0x1b   :  { %p621_p12 = scmp.ne.s32.totalorder %s40_s2, %s620_s21  ;;  %s622_s24 = scalar_lea.hbm %s919_s3, 512 }
  0x1c   :  { %p623_p13 = scmp.lt.u32.totalorder %s40_s2, %s919_s3  ;;  %p624_p0 = scmp.lt.u32.totalorder %s622_s24, %s620_s21 }
  0x1d   :  { %p626_p2 = scmp.lt.u32.totalorder %s620_s21, %s40_s2 }
  0x1e   :  { %p625_p1 = por %p624_p0, %p623_p13 }
  0x20   :  { %p627_p3 = por %p626_p2, %p625_p1 }
  0x22   :  { %p628_p4 = pnand %p627_p3, %p621_p12 }
  0x24   :  { %631 = shalt.err (!%p628_p4)
}
  0x25   :  { %s632_s26 = scalar_lea.vmem %s42_s20, 512  ;;  %p637_p6 = scmp.lt.s32.totalorder %s42_s20, %s42_s20 }
  0x26   :  { %p633_p5 = scmp.ne.s32.totalorder %s42_s20, %s632_s26  ;;  %p638_p7 = scmp.lt.s32.totalorder %s632_s26, %s632_s26 }
  0x28   :  { %p639_p8 = por %p638_p7, %p637_p6 }
  0x2a   :  { %p640_p9 = pnand %p639_p8, %p633_p5 }
  0x2c   :  { %643 = shalt.err (!%p640_p9)
}
  0x2d   :  { %47 = dma.hbm_to_vmem [thread:$0]  %s40_s2, 512, %s42_s20, [#allocation9], %s673_s15, %s673_s15, %s674_s16  }
  0x2e   :  { %666 = dma.done.wait [#allocation6], 512  }
  0x2f   :  { %667 = vsyncadd [#allocation6], 4294966784 }
  0x30   :  { %668 = dma.done.wait [#allocation9], 512  }
  0x31   :  { %669 = vsyncadd [#allocation9], 4294966784  ;;  %vm109_vm0 = vcmask 257024   ;;  %v236_v0 = vld [vmem:[#allocation8] sm:$0xf]  ;;  %vm191_vm1 = vcmask 1041409   ;;  %p505_p12 = scmp.eq.s32.totalorder %s916_s0, %s917_s1 }
  0x32   :  { %v237_v1 = vld [vmem:[#allocation8 + $0x4] sm:$0xf]  ;;  %v238_v2 = vld [vmem:[#allocation8 + $0x8] sm:$0xf]  ;;  %v239_v3 = vld [vmem:[#allocation8 + $0xc] sm:$0xf] }
  0x33   :  { %v240_v4 = vld [vmem:[#allocation8 + $0x10] sm:$0xf]  ;;  %v241_v5 = vld [vmem:[#allocation8 + $0x14] sm:$0xf]  ;;  %v242_v6 = vld [vmem:[#allocation8 + $0x18] sm:$0xf] }
  0x34   :  { %v244_v7 = vsel %vm109_vm0, %v236_v0, 0.0  ;;  %v251_v8 = vsel %vm109_vm0, %v237_v1, 0.0  ;;  %v243_v9 = vld [vmem:[#allocation8 + $0x1c] sm:$0xf]  ;;  %v258_v12 = vsel %vm109_vm0, %v238_v2, 0.0  ;;  %v265_v13 = vsel %vm109_vm0, %v239_v3, 0.0 }
  0x35   :  { %v245_v10 = vrot.slane %v244_v7, 4  ;;  %v252_v11 = vrot.slane %v251_v8, 4  ;;  %v259_v14 = vrot.slane %v258_v12, 4  ;;  %v266_v15 = vrot.slane %v265_v13, 4  ;;  %v101_v2 = vld [vmem:[#allocation5] sm:$0xf] }
  0x36   :  { %v272_v16 = vsel %vm109_vm0, %v240_v4, 0.0  ;;  %v279_v17 = vsel %vm109_vm0, %v241_v5, 0.0  ;;  %v286_v24 = vsel %vm109_vm0, %v242_v6, 0.0  ;;  %v293_v25 = vsel %vm109_vm0, %v243_v9, 0.0  ;;  %p83_p10 = scmp.lt.s32.totalorder %s916_s0, 0  ;;  %p89_p11 = scmp.lt.s32.totalorder %s917_s1, 0 }
  0x37   :  { %v246_v18 = vadd.f32 %v245_v10, %v244_v7  ;;  %v253_v19 = vadd.f32 %v252_v11, %v251_v8  ;;  %v273_v20 = vrot.slane %v272_v16, 4  ;;  %v280_v21 = vrot.slane %v279_v17, 4  ;;  %v102_v11 = vld [vmem:[#allocation5 + $0x4] sm:$0xf]  ;;  %s569_s20 = sshll.u32 %s916_s0, 3  ;;  %s570_s23 = sshll.u32 %s917_s1, 3 }
  0x38   :  { %v260_v22 = vadd.f32 %v259_v14, %v258_v12  ;;  %v267_v23 = vadd.f32 %v266_v15, %v265_v13  ;;  %v287_v32 = vrot.slane %v286_v24, 4  ;;  %v294_v33 = vrot.slane %v293_v25, 4  ;;  %v103_v12 = vld [vmem:[#allocation5 + $0x8] sm:$0xf]  ;;  %v104_v13 = vld [vmem:[#allocation5 + $0xc] sm:$0xf] }
  0x39   :  { %v247_v26 = vrot.slane %v246_v18, 2  ;;  %v254_v27 = vrot.slane %v253_v19, 2  ;;  %v274_v28 = vadd.f32 %v273_v20, %v272_v16  ;;  %v281_v29 = vadd.f32 %v280_v21, %v279_v17  ;;  %v105_v21 = vld [vmem:[#allocation5 + $0x10] sm:$0xf]  ;;  %s84_s7 = scalar_select %p83_p10, %s916_s0, 0 }
  0x3a   :  { %v261_v30 = vrot.slane %v260_v22, 2  ;;  %v268_v31 = vrot.slane %v267_v23, 2  ;;  %vm193_vm2 = vcmask 1042434   ;;  %vm195_vm3 = vcmask 1043459   ;;  %s90_s15 = scalar_select %p89_p11, %s917_s1, 0 }
  0x3b   :  { %v248_v34 = vadd.f32 %v247_v26, %v246_v18  ;;  %v255_v35 = vadd.f32 %v254_v27, %v253_v19  ;;  %v275_v36 = vrot.slane %v274_v28, 2  ;;  %v282_v37 = vrot.slane %v281_v29, 2  ;;  %s564_s8 = sshll.u32 %s84_s7, 3  ;;  %s679_s28 = smov [#allocation10]  }
  0x3c   :  { %v262_v38 = vadd.f32 %v261_v30, %v260_v22  ;;  %v269_v39 = vadd.f32 %v268_v31, %v267_v23  ;;  %v288_v40 = vadd.f32 %v287_v32, %v286_v24  ;;  %v295_v41 = vadd.f32 %v294_v33, %v293_v25  ;;  %v106_v24 = vld [vmem:[#allocation5 + $0x14] sm:$0xf]  ;;  %s86_s11 = scalar_lea.vmem %s920_s4, %s564_s8  ;;  %s91_s18 = scalar_lea.vmem %s921_s5, %s90_s15 }
  0x3d   :  { %vm197_vm4 = vcmask 1044484   ;;  %v249_v42 = vrot.slane %v248_v34, 1  ;;  %v256_v43 = vrot.slane %v255_v35, 1  ;;  %v276_v44 = vadd.f32 %v275_v36, %v274_v28  ;;  %s506_s26 = scalar_select %p505_p12, 1.0, 2.0 }
  0x3e   :  { %v283_v45 = vadd.f32 %v282_v37, %v281_v29  ;;  %vm199_vm5 = vcmask 1045509   ;;  %v263_v46 = vrot.slane %v262_v38, 1  ;;  %v270_v47 = vrot.slane %v269_v39, 1  ;;  %v107_v37 = vld [vmem:[#allocation5 + $0x18] sm:$0xf]  ;;  %s537_s29 = sshll.u32 %s679_s28, 4  ;;  %s538_s29 = int_to_ptr.vmem [resolvable:$true] %s537_s29 }
  0x3f   :  { %v289_v48 = vrot.slane %v288_v40, 2  ;;  %v296_v49 = vrot.slane %v295_v41, 2  ;;  %vm201_vm6 = vcmask 1046534   ;;  %v250_v50 = vadd.f32 %v249_v42, %v248_v34  ;;  %s644_s30 = scalar_lea.vmem %s538_s29, 16  ;;  %s648_s7 = scalar_lea.vmem %s538_s29, 32 }
  0x40   :  { %v257_v51 = vadd.f32 %v256_v43, %v255_v35  ;;  %v277_v52 = vrot.slane %v276_v44, 1  ;;  %v284_v53 = vrot.slane %v283_v45, 1  ;;  %vm203_vm7 = vcmask 1047559   ;;  %p645_p13 = scmp.ne.s32.totalorder %s538_s29, %s644_s30  ;;  %p649_p0 = scmp.lt.s32.totalorder %s538_s29, %s538_s29 }
  0x41   :  { %v264_v54 = vadd.f32 %v263_v46, %v262_v38  ;;  %v271_v55 = vadd.f32 %v270_v47, %v269_v39  ;;  %v290_v56 = vadd.f32 %v289_v48, %v288_v40  ;;  %v297_v57 = vadd.f32 %v296_v49, %v295_v41  ;;  %v108_v46 = vld [vmem:[#allocation5 + $0x1c] sm:$0xf]  ;;  %p650_p1 = scmp.lt.s32.totalorder %s648_s7, %s644_s30 }
  0x42   :  { %vm206_vm8 = vcmask 261120   ;;  %v278_v58 = vadd.f32 %v277_v52, %v276_v44  ;;  %v285_v59 = vadd.f32 %v284_v53, %v283_v45  ;;  %v747_v60 = vmul.f32 0.25, %v250_v50 }
  0x43   :  { %v749_v61 = vmul.f32 0.25, %v257_v51  ;;  %v291_v62 = vrot.slane %v290_v56, 1  ;;  %v298_v63 = vrot.slane %v297_v57, 1  ;;  %v751_v0 = vmul.f32 0.25, %v264_v54  ;;  %p651_p2 = por %p650_p1, %p649_p0 }
  0x44   :  { %v753_v1 = vmul.f32 0.25, %v271_v55  ;;  %v755_v3 = vmul.f32 0.25, %v278_v58  ;;  %v757_v4 = vmul.f32 0.25, %v285_v59  ;;  %v308_v5 = vmul.f32 %v747_v60, %v747_v60 }
  0x45   :  { %v309_v6 = vmul.f32 %v749_v61, %v749_v61  ;;  %v292_v7 = vadd.f32 %v291_v62, %v290_v56  ;;  %v299_v8 = vadd.f32 %v298_v63, %v297_v57  ;;  %v310_v9 = vmul.f32 %v751_v0, %v751_v0  ;;  %p652_p3 = pnand %p651_p2, %p645_p13 }
  0x46   :  { %v311_v10 = vmul.f32 %v753_v1, %v753_v1  ;;  %v312_v14 = vmul.f32 %v755_v3, %v755_v3  ;;  %v313_v15 = vmul.f32 %v757_v4, %v757_v4  ;;  %v110_v17 = vsel %vm109_vm0, %v101_v2, 0.0 }
  0x47   :  { %v324_v16 = vsel %vm191_vm1, %v309_v6, %v308_v5  ;;  %v773_v18 = vmul.f32 0.25, %v292_v7  ;;  %v775_v19 = vmul.f32 0.25, %v299_v8  ;;  %v111_v22 = vrot.slane %v110_v17, 4 }
  0x48   :  { %v325_v20 = vsel %vm193_vm2, %v310_v9, %v324_v16  ;;  %v117_v25 = vsel %vm109_vm0, %v102_v11, 0.0  ;;  %v124_v26 = vsel %vm109_vm0, %v103_v12, 0.0  ;;  %v131_v27 = vsel %vm109_vm0, %v104_v13, 0.0 }
  0x49   :  { %v326_v23 = vsel %vm195_vm3, %v311_v10, %v325_v20  ;;  %v314_v28 = vmul.f32 %v773_v18, %v773_v18  ;;  %v315_v29 = vmul.f32 %v775_v19, %v775_v19  ;;  %v112_v31 = vadd.f32 %v111_v22, %v110_v17 }
  0x4a   :  { %v327_v30 = vsel %vm197_vm4, %v312_v14, %v326_v23  ;;  %v118_v33 = vrot.slane %v117_v25, 4  ;;  %v125_v34 = vrot.slane %v124_v26, 4  ;;  %v132_v35 = vrot.slane %v131_v27, 4 }
  0x4b   :  { %v328_v32 = vsel %vm199_vm5, %v313_v15, %v327_v30  ;;  %v113_v38 = vrot.slane %v112_v31, 2  ;;  %v138_v39 = vsel %vm109_vm0, %v105_v21, 0.0  ;;  %v145_v40 = vsel %vm109_vm0, %v106_v24, 0.0 }
  0x4c   :  { %v329_v36 = vsel %vm201_vm6, %v314_v28, %v328_v32  ;;  %v119_v42 = vadd.f32 %v118_v33, %v117_v25  ;;  %v126_v43 = vadd.f32 %v125_v34, %v124_v26  ;;  %v133_v44 = vadd.f32 %v132_v35, %v131_v27 }
  0x4d   :  { %v330_v41 = vsel %vm203_vm7, %v315_v29, %v329_v36  ;;  %v114_v47 = vadd.f32 %v113_v38, %v112_v31  ;;  %v139_v48 = vrot.slane %v138_v39, 4  ;;  %v146_v49 = vrot.slane %v145_v40, 4 }
  0x4e   :  { %v332_v45 = vsel %vm206_vm8, %v330_v41, 0.0  ;;  %v120_v50 = vrot.slane %v119_v42, 2  ;;  %v127_v51 = vrot.slane %v126_v43, 2  ;;  %v134_v52 = vrot.slane %v133_v44, 2 }
  0x4f   :  { %333 = vadd.xlane.f32.xlu0 %v332_v45  ;;  %v152_v53 = vsel %vm109_vm0, %v107_v37, 0.0  ;;  %v115_v54 = vrot.slane %v114_v47, 1  ;;  %v140_v55 = vadd.f32 %v139_v48, %v138_v39  ;;  %v147_v56 = vadd.f32 %v146_v49, %v145_v40 }
  0x50   :  { %v153_v57 = vrot.slane %v152_v53, 4  ;;  %v121_v58 = vadd.f32 %v120_v50, %v119_v42  ;;  %v128_v59 = vadd.f32 %v127_v51, %v126_v43  ;;  %v135_v62 = vadd.f32 %v134_v52, %v133_v44 }
  0x51   :  { %v159_v63 = vsel %vm109_vm0, %v108_v46, 0.0  ;;  %v116_v2 = vadd.f32 %v115_v54, %v114_v47  ;;  %v141_v5 = vrot.slane %v140_v55, 2  ;;  %v148_v6 = vrot.slane %v147_v56, 2 }
  0x52   :  { %v154_v7 = vadd.f32 %v153_v57, %v152_v53  ;;  %v122_v8 = vrot.slane %v121_v58, 1  ;;  %v129_v9 = vrot.slane %v128_v59, 1  ;;  %v136_v10 = vrot.slane %v135_v62, 1 }
  0x53   :  { %v160_v11 = vrot.slane %v159_v63, 4  ;;  %v142_v12 = vadd.f32 %v141_v5, %v140_v55  ;;  %v149_v13 = vadd.f32 %v148_v6, %v147_v56  ;;  %v795_v15 = vmul.f32 0.25, %v116_v2 }
  0x54   :  { %v155_v14 = vrot.slane %v154_v7, 2  ;;  %v123_v16 = vadd.f32 %v122_v8, %v121_v58  ;;  %v130_v17 = vadd.f32 %v129_v9, %v128_v59  ;;  %v137_v20 = vadd.f32 %v136_v10, %v135_v62  ;;  %v479_v58 = vld [vmem:[%s86_s11] sm:$0xff] }
  0x55   :  { %v161_v21 = vadd.f32 %v160_v11, %v159_v63  ;;  %v143_v22 = vrot.slane %v142_v12, 1  ;;  %v150_v23 = vrot.slane %v149_v13, 1  ;;  %v175_v25 = vmul.f32 %v795_v15, %v795_v15 }
  0x56   :  { %v156_v24 = vadd.f32 %v155_v14, %v154_v7  ;;  %v799_v27 = vmul.f32 0.25, %v123_v16  ;;  %v801_v28 = vmul.f32 0.25, %v130_v17  ;;  %v803_v29 = vmul.f32 0.25, %v137_v20 }
  0x57   :  { %v162_v26 = vrot.slane %v161_v21, 2  ;;  %v144_v30 = vadd.f32 %v143_v22, %v142_v12  ;;  %v151_v31 = vadd.f32 %v150_v23, %v149_v13  ;;  %vm97_vm9 = vcmask 0  }
  0x58   :  { %v157_v32 = vrot.slane %v156_v24, 1  ;;  %v176_v34 = vmul.f32 %v799_v27, %v799_v27  ;;  %v177_v35 = vmul.f32 %v801_v28, %v801_v28  ;;  %v178_v36 = vmul.f32 %v803_v29, %v803_v29 }
  0x59   :  { %v163_v33 = vadd.f32 %v162_v26, %v161_v21  ;;  %v811_v38 = vmul.f32 0.25, %v144_v30  ;;  %v813_v39 = vmul.f32 0.25, %v151_v31  ;;  %v676_v56 = vmov 0.0  }
  0x5a   :  { %v158_v37 = vadd.f32 %v157_v32, %v156_v24  ;;  %v192_v41 = vsel %vm191_vm1, %v176_v34, %v175_v25  ;;  %98 = vst.msk [vmem:[#allocation10] sm:$0x1] %vm97_vm9, %v676_v56  ;;  %575 = vmatprep.subr.mxu0 %v676_v56  ;;  %vm677_vm10 = vmmov 0   ;;  %v678_v57 = vmov 0  }
  0x5b   :  { %v164_v40 = vrot.slane %v163_v33, 1  ;;  %v179_v43 = vmul.f32 %v811_v38, %v811_v38  ;;  %v180_v44 = vmul.f32 %v813_v39, %v813_v39  ;;  %v194_v45 = vsel %vm193_vm2, %v177_v35, %v192_v41  ;;  %577 = vmatprep.mubr.msk.f32.mxu0 %vm677_vm10, %v676_v56  ;;  %590 = vset.pattern.permute.xlu1 %v678_v57 }
  0x5c   :  { %v816_v42 = vmul.f32 0.25, %v158_v37  ;;  %v196_v47 = vsel %vm195_vm3, %v178_v36, %v194_v45  ;;  %591 = vset.pattern.permute.xlu0 %v678_v57  ;;  %482 = vperm.xlu1 %590, %v479_v58   ;;  %vm508_vm13 = vcmask 64512  }
  0x5d   :  { %v165_v46 = vadd.f32 %v164_v40, %v163_v33  ;;  %v198_v49 = vsel %vm197_vm4, %v179_v43, %v196_v47 }
  0x5e   :  { %v181_v48 = vmul.f32 %v816_v42, %v816_v42  ;;  %v200_v51 = vsel %vm199_vm5, %v180_v44, %v198_v49 }
  0x5f   :  { %v827_v50 = vmul.f32 0.25, %v165_v46 }
  0x60   :  { %v202_v52 = vsel %vm201_vm6, %v181_v48, %v200_v51 }
  0x61   :  { %v182_v53 = vmul.f32 %v827_v50, %v827_v50 }
  0x63   :  { %v204_v54 = vsel %vm203_vm7, %v182_v53, %v202_v52 }
  0x64   :  { %v207_v55 = vsel %vm206_vm8, %v204_v54, 0.0 }
  0x65   :  { %208 = vadd.xlane.f32.xlu0 %v207_v55 }
  0xdc   :  { %v334_v59 = vpop.xlane.xlu0 %333 }
  0xdd   :  { %v335_v62 = vmax.f32 %v334_v59, 1e-24 }
  0xdf   :  { %592 = vrsqrt.f32 %v335_v62 }
  0xe9   :  { %v593_v63 = vpop.eup %592 }
  0xea   :  { %v338_v2 = vrot.slane %v593_v63, 1  ;;  %v339_v5 = vrot.slane %v593_v63, 2  ;;  %v340_v6 = vrot.slane %v593_v63, 3  ;;  %v341_v7 = vrot.slane %v593_v63, 4 }
  0xeb   :  { %v342_v8 = vrot.slane %v593_v63, 5  ;;  %v343_v9 = vrot.slane %v593_v63, 6  ;;  %v344_v10 = vrot.slane %v593_v63, 7  ;;  %v353_v16 = vmul.f32 %v593_v63, %v747_v60  ;;  %v567_v63 = vld [vmem:[%s91_s18] ss:$0 sm:$0xff] }
  0xec   :  { %v354_v11 = vmul.f32 %v338_v2, %v749_v61  ;;  %v355_v12 = vmul.f32 %v339_v5, %v751_v0  ;;  %v356_v13 = vmul.f32 %v340_v6, %v753_v1  ;;  %v357_v14 = vmul.f32 %v341_v7, %v755_v3  ;;  %v483_v2 = vpop.permute.xlu1 %482 }
  0xed   :  { %v358_v17 = vmul.f32 %v342_v8, %v757_v4  ;;  %v359_v22 = vmul.f32 %v343_v9, %v773_v18  ;;  %v360_v23 = vmul.f32 %v344_v10, %v775_v19  ;;  %vm488_vm11 = vcmp.eq.s32.totalorder %v483_v2, %v567_v63 }
  0xee   :  { %v391_v20 = vrot.slane %v354_v11, 7  ;;  %v393_v21 = vrot.slane %v355_v12, 6  ;;  %v395_v25 = vrot.slane %v356_v13, 5  ;;  %v397_v0 = vrot.slane %v357_v14, 4 }
  0xef   :  { %v399_v3 = vrot.slane %v358_v17, 3  ;;  %v401_v4 = vrot.slane %v359_v22, 2  ;;  %v403_v32 = vrot.slane %v360_v23, 1  ;;  %v496_v7 = vstv %s569_s20 }
  0xf0   :  { %v392_v24 = vsel %vm191_vm1, %v391_v20, %v353_v16  ;;  %v501_v8 = vstv %s570_s23  ;;  %v568_v9 = vsel %vm488_vm11, 1.0, %v676_v56  ;;  %v520_v56 = vstv %s506_s26 }
  0xf1   :  { %v394_v61 = vsel %vm193_vm2, %v393_v21, %v392_v24 }
  0xf2   :  { %v209_v26 = vpop.xlane.xlu0 %208  ;;  %v396_v1 = vsel %vm195_vm3, %v395_v25, %v394_v61 }
  0xf3   :  { %v210_v30 = vmax.f32 %v209_v26, 1e-24  ;;  %v398_v60 = vsel %vm197_vm4, %v397_v0, %v396_v1  ;;  %v507_v26 = vld [vmem:[#allocation10] sm:$0x1] }
  0xf4   :  { %v400_v31 = vsel %vm199_vm5, %v399_v3, %v398_v60 }
  0xf5   :  { %594 = vrsqrt.f32 %v210_v30  ;;  %v402_v18 = vsel %vm201_vm6, %v401_v4, %v400_v31 }
  0xf6   :  { %v404_v19 = vsel %vm203_vm7, %v403_v32, %v402_v18 }
  0xf7   :  { %576 = vmatpush3.xpose.msk.msra.mxu0 %vm206_vm8, %v404_v19 }
  0xff   :  { %v595_v33 = vpop.eup %594 }
 0x100   :  { %v213_v34 = vrot.slane %v595_v33, 1  ;;  %v214_v35 = vrot.slane %v595_v33, 2  ;;  %v215_v36 = vrot.slane %v595_v33, 3  ;;  %v216_v37 = vrot.slane %v595_v33, 4 }
 0x101   :  { %v217_v40 = vrot.slane %v595_v33, 5  ;;  %v218_v41 = vrot.slane %v595_v33, 6  ;;  %v219_v43 = vrot.slane %v595_v33, 7  ;;  %v228_v48 = vmul.f32 %v595_v33, %v795_v15 }
 0x102   :  { %v229_v44 = vmul.f32 %v213_v34, %v799_v27  ;;  %v230_v45 = vmul.f32 %v214_v35, %v801_v28  ;;  %v231_v46 = vmul.f32 %v215_v36, %v803_v29  ;;  %v232_v47 = vmul.f32 %v216_v37, %v811_v38 }
 0x103   :  { %v233_v49 = vmul.f32 %v217_v40, %v813_v39  ;;  %v234_v53 = vmul.f32 %v218_v41, %v816_v42  ;;  %v235_v54 = vmul.f32 %v219_v43, %v827_v50  ;;  %v494_v50 = vlaneseq }
 0x104   :  { %v369_v51 = vrot.slane %v229_v44, 7  ;;  %v371_v52 = vrot.slane %v230_v45, 6  ;;  %v373_v57 = vrot.slane %v231_v46, 5  ;;  %v375_v28 = vrot.slane %v232_v47, 4 }
 0x105   :  { %v377_v58 = vrot.slane %v233_v49, 3  ;;  %v379_v15 = vrot.slane %v234_v53, 2  ;;  %v381_v59 = vrot.slane %v235_v54, 1  ;;  %v495_v5 = vshrl.u32 %v494_v50, 7 }
 0x106   :  { %v370_v55 = vsel %vm191_vm1, %v369_v51, %v228_v48  ;;  %v500_v6 = vand.u32 127, %v494_v50 }
 0x107   :  { %v372_v27 = vsel %vm193_vm2, %v371_v52, %v370_v55  ;;  %v497_v10 = vadd.s32 %v496_v7, %v495_v5 }
 0x108   :  { %v374_v29 = vsel %vm195_vm3, %v373_v57, %v372_v27  ;;  %v502_v11 = vadd.s32 %v501_v8, %v500_v6 }
 0x109   :  { %v376_v38 = vsel %vm197_vm4, %v375_v28, %v374_v29 }
 0x10a   :  { %v378_v39 = vsel %vm199_vm5, %v377_v58, %v376_v38  ;;  %vm503_vm12 = vcmp.eq.s32.totalorder %v497_v10, %v502_v11 }
 0x10b   :  { %v380_v62 = vsel %vm201_vm6, %v379_v15, %v378_v39 }
 0x10c   :  { %v382_v42 = vsel %vm203_vm7, %v381_v59, %v380_v62 }
 0x10d   :  { %578 = vmatmul.mubr.msk.f32.vlgmr.msra.gmra.mrb[0].mxu0 %vm206_vm8, %v382_v42 }
 0x1e0   :  { %v475_v12 = vpop.f32.mrb[0].mxu0 }
 0x1e1   :  { %v491_v13 = vsub.f32 %v568_v9, %v475_v12  ;;  %v579_v14 = vpop.f32.mrb[1].mxu0 }
 0x1e3   :  { %v492_v16 = vmul.f32 %v491_v13, %v491_v13 }
 0x1e5   :  { %v504_v17 = vsel %vm503_vm12, 0.0, %v492_v16 }
 0x1e6   :  { %v509_v20 = vsel %vm508_vm13, %v504_v17, 0.0 }
 0x1e7   :  { %510 = vadd.xlane.f32.xlu1 %v509_v20 }
 0x274   :  { %v511_v21 = vpop.xlane.xlu1 %510 }
 0x275   :  { %v512_v22 = vrot.slane %v511_v21, 4 }
 0x277   :  { %v513_v23 = vadd.f32 %v512_v22, %v511_v21 }
 0x279   :  { %v514_v24 = vrot.slane %v513_v23, 2 }
 0x27b   :  { %v515_v25 = vadd.f32 %v514_v24, %v513_v23 }
 0x27d   :  { %v516_v61 = vrot.slane %v515_v25, 1 }
 0x27f   :  { %v517_v0 = vadd.f32 %v516_v61, %v515_v25 }
 0x281   :  { %580 = vpush %v517_v0 }
 0x2b2   :  { %s581_s3 = spop %580 }
 0x2b3   :  { %v519_v1 = vstv %s581_s3 }
 0x2b4   :  { %v521_v3 = vmul.f32 %v520_v56, %v519_v1 }
 0x2b6   :  { %v522_v30 = vadd.f32 %v521_v3, %v507_v26 }
 0x2b8   :  { %524 = vst.msk [vmem:[#allocation10] sm:$0x1] %vm97_vm9, %v522_v30 }
 0x2bf   :  { %v528_v60 = vld [vmem:[#allocation10] sm:$0x1] }
 0x2c0   :  { %v529_v4 = vmul.f32 0.015625, %v528_v60 }
 0x2c2   :  { %530 = vst.msk [vmem:[#allocation10] sm:$0x1] %vm97_vm9, %v529_v4 }
 0x2c3   :  { %655 = shalt.err (!%p652_p3)
}
 0x2c4   :  { %s656_s8 = scalar_lea.hbm %s922_s6, 16 }
 0x2c5   :  { %p657_p4 = scmp.ne.s32.totalorder %s922_s6, %s656_s8  ;;  %p660_p5 = scmp.lt.u32.totalorder %s656_s8, %s922_s6 }
 0x2c7   :  { %p662_p6 = pnand %p660_p5, %p657_p4 }
 0x2c9   :  { %665 = shalt.err (!%p662_p6)
}
 0x2ca   :  { %540 = dma.vmem_to_hbm [thread:$0]  %s538_s29, 16, %s922_s6, [#allocation7]  }
 0x2cb   :  { %670 = dma.done.wait [#allocation7], 16  }
 0x2cc   :  { %671 = vsyncadd [#allocation7], 4294967280 }
 0x2cd   :  { %544 = vsyncpa [#allocation6], 1 }
 0x2ce   :  { %545 = vsyncpa [#allocation9], 1 }
 0x2cf   :  { %546 = vsyncpa [#allocation7], 1 }

</bundles_post_ra>
